<compile_context>
chip_gen: v7x
topology: tpu7x:2x2x1
jax: 0.10.0
libtpu: 0.0.40
codegen_flags: <defaults>
</compile_context>

<pallas_src>
import math

import jax
import jax.numpy as jnp
from jax.experimental import pallas as pl
from jax.experimental.pallas import tpu as pltpu


# ---------------------------------------------------------------------------
# helpers
# ---------------------------------------------------------------------------
def _cdiv(a, b):
    return -(-a // b)


def _round_up(x, m):
    return _cdiv(x, m) * m


def _block_diag(w, p):
    """(r, c) -> (p*r, p*c) block-diagonal matrix holding p copies of w."""
    if p == 1:
        return w
    r, c = w.shape
    eye = jnp.eye(p, dtype=w.dtype)
    return (eye[:, None, :, None] * w[None, :, None, :]).reshape(p * r, p * c)


def _pick_pack(emb_size, out_dim, batch, max_pack=16):
    """Row-packing factor p so p*E and p*out_dim are 128-lane dense (if B allows)."""
    pe = 128 // math.gcd(emb_size, 128)
    po = 128 // math.gcd(out_dim, 128)
    lcm = pe * po // math.gcd(pe, po)
    for p in (lcm, max(pe, po), min(pe, po), 2):
        if 1 < p <= max_pack and batch % p == 0:
            return p
    return 1


# ---------------------------------------------------------------------------
# kernel
# ---------------------------------------------------------------------------
def _prefix_gen_kernel(x0_ref, x1_ref, x2_ref, w1a_ref, w1b_ref, w1c_ref,
                       b1_ref, w2_ref, b2_ref, o_ref):
    # hidden = relu(concat(x0,x1,x2) @ W1 + b1), computed as a sum of three
    # matmuls so the concat never touches HBM.  f32 accumulation on the MXU.
    h = jnp.dot(x0_ref[...], w1a_ref[...], preferred_element_type=jnp.float32)
    h = h + jnp.dot(x1_ref[...], w1b_ref[...], preferred_element_type=jnp.float32)
    h = h + jnp.dot(x2_ref[...], w1c_ref[...], preferred_element_type=jnp.float32)
    h = jnp.maximum(h + b1_ref[...], 0.0)               # f32 bias, f32 acc
    o = jnp.dot(h.astype(w2_ref.dtype), w2_ref[...],
                preferred_element_type=jnp.float32)
    o_ref[...] = (o + b2_ref[...]).astype(o_ref.dtype)


# ---------------------------------------------------------------------------
# wrapper
# ---------------------------------------------------------------------------
def prefix_gen_forward(side_infos, params, *, emb_size, encoder_layers,
                       batch_tile=None, stream_dtype=None, out_dtype=None,
                       target_step_bytes=2 << 20, vmem_budget_bytes=40 << 20):
    """side_infos: list of exactly three (B, emb_size) arrays.

    stream_dtype: dtype used to stream activations/weights from HBM (e.g.
      jnp.bfloat16 -- recommended on v5e/v6e).  Accumulation & biases stay f32.
    out_dtype: dtype of the streamed output (defaults to the input dtype).
    batch_tile: optional cap on rows (original, unpacked rows) per grid step.
    """
    assert len(side_infos) == 3
    x0, x1, x2 = side_infos
    B, E = x0.shape
    assert E == emb_size
    assert x1.shape == (B, E) and x2.shape == (B, E)
    out_dim = emb_size * encoder_layers

    in_dtype = x0.dtype
    stream_dtype = jnp.dtype(in_dtype if stream_dtype is None else stream_dtype)
    out_dtype = jnp.dtype(in_dtype if out_dtype is None else out_dtype)
    sbytes = stream_dtype.itemsize
    obytes = out_dtype.itemsize

    # ---- lane-dense row packing (free HBM-side reshapes + block-diag weights)
    pack = _pick_pack(E, out_dim, B)
    E_eff, out_eff, B_eff = pack * E, pack * out_dim, B // pack

    x0 = jnp.asarray(x0, stream_dtype).reshape(B_eff, E_eff)
    x1 = jnp.asarray(x1, stream_dtype).reshape(B_eff, E_eff)
    x2 = jnp.asarray(x2, stream_dtype).reshape(B_eff, E_eff)

    w1 = jnp.asarray(params["w1"], stream_dtype)          # (3E, E)
    w2 = jnp.asarray(params["w2"], stream_dtype)          # (E, E*L)
    w1a = _block_diag(w1[0 * E:1 * E, :], pack)           # (E_eff, E_eff)
    w1b = _block_diag(w1[1 * E:2 * E, :], pack)
    w1c = _block_diag(w1[2 * E:3 * E, :], pack)
    w2p = _block_diag(w2, pack)                           # (E_eff, out_eff)
    b1p = jnp.tile(jnp.asarray(params["b1"], jnp.float32).reshape(1, -1), (1, pack))
    b2p = jnp.tile(jnp.asarray(params["b2"], jnp.float32).reshape(1, -1), (1, pack))

    # ---- batch tile: target ~2 MiB streamed per grid step, sublane aligned
    sub = max(8, 32 // min(sbytes, obytes))               # 8 (f32) / 16 (bf16) / 32 (i8)
    bytes_per_row = 3 * E_eff * sbytes + out_eff * obytes
    if batch_tile is not None:
        desired = max(1, batch_tile // pack)
    else:
        desired = max(sub, int(target_step_bytes) // max(bytes_per_row, 1))

    if desired >= B_eff:
        tb = B_eff
    else:
        tb = min(B_eff, max(sub, (desired // sub) * sub))

    # megacore (v7x): prefer >= 2 (and even) grid steps when the batch allows
    if tb >= B_eff:
        tb = B_eff
        if B_eff > sub:
            tb = min(B_eff, _round_up(_cdiv(B_eff, 2), sub))
    else:
        steps = _cdiv(B_eff, tb)
        if steps > 1 and steps % 2 == 1:
            tb2 = _round_up(_cdiv(B_eff, steps + 1), sub)
            if tb2 >= sub and _cdiv(B_eff, tb2) % 2 == 0:
                tb = tb2

    # ---- padded VMEM estimate (lane-128 / sublane padding, double buffering,
    #      materialized f32 hidden and pre-cast f32 output included)
    lane = 128
    E_pad = _round_up(E_eff, lane)
    out_pad = _round_up(out_eff, lane)

    def _vmem_estimate(tb_rows):
        tb_pad = _round_up(tb_rows, sub)
        x_tiles = 2 * 3 * tb_pad * E_pad * sbytes
        o_tiles = 2 * tb_pad * out_pad * obytes
        weights = 2 * (3 * _round_up(E_eff, sub) * E_pad
                       + _round_up(E_eff, sub) * out_pad) * sbytes
        biases = 2 * 8 * (E_pad + out_pad) * 4
        hidden = tb_pad * E_pad * 4 + tb_pad * out_pad * 4
        if sbytes < 4:
            hidden += tb_pad * E_pad * sbytes            # bf16 cast copy of h
        return x_tiles + o_tiles + weights + biases + hidden

    while _vmem_estimate(tb) > vmem_budget_bytes and tb > sub:
        tb = max(sub, _round_up(_cdiv(tb, 2), sub))

    vmem_needed = _vmem_estimate(tb)
    vmem_limit = int(min(max(vmem_needed + (vmem_needed >> 2) + (2 << 20),
                             32 << 20), 48 << 20))

    grid = (_cdiv(B_eff, tb),)                            # ragged last block is masked

    # ---- advisory cost estimate for the XLA scheduler
    flops = 2 * B_eff * (3 * E_eff * E_eff + E_eff * out_eff)
    bytes_accessed = (B_eff * bytes_per_row
                      + (3 * E_eff * E_eff + E_eff * out_eff) * sbytes
                      + (E_eff + out_eff) * 4)
    cost = pl.CostEstimate(flops=int(flops), transcendentals=0,
                           bytes_accessed=int(bytes_accessed))

    out = pl.pallas_call(
        _prefix_gen_kernel,
        out_shape=jax.ShapeDtypeStruct((B_eff, out_eff), out_dtype),
        grid_spec=pl.GridSpec(
            grid=grid,
            in_specs=[
                pl.BlockSpec((tb, E_eff), lambda i: (i, 0)),        # x0 tile
                pl.BlockSpec((tb, E_eff), lambda i: (i, 0)),        # x1 tile
                pl.BlockSpec((tb, E_eff), lambda i: (i, 0)),        # x2 tile
                pl.BlockSpec((E_eff, E_eff), lambda i: (0, 0)),     # W1a (resident)
                pl.BlockSpec((E_eff, E_eff), lambda i: (0, 0)),     # W1b (resident)
                pl.BlockSpec((E_eff, E_eff), lambda i: (0, 0)),     # W1c (resident)
                pl.BlockSpec((1, E_eff), lambda i: (0, 0)),         # b1
                pl.BlockSpec((E_eff, out_eff), lambda i: (0, 0)),   # W2 (resident)
                pl.BlockSpec((1, out_eff), lambda i: (0, 0)),       # b2
            ],
            out_specs=pl.BlockSpec((tb, out_eff), lambda i: (i, 0)),
        ),
        compiler_params=pltpu.CompilerParams(
            dimension_semantics=("parallel",),
            vmem_limit_bytes=vmem_limit,
        ),
        cost_estimate=cost,
    )(x0, x1, x2, w1a, w1b, w1c, b1p, w2p, b2p)

    # (B_eff, pack*out_dim) row-major == (B, out_dim) -> reshape(-1, 1, L, E)
    return out.reshape(-1, 1, encoder_layers, emb_size)


# ---------------------------------------------------------------------------
# params / reference
# ---------------------------------------------------------------------------
def init_params(key, emb_size, encoder_layers, dtype=jnp.float32):
    """Matches PyTorch init_weights: normal(mean=0, std=0.01) for weights & biases."""
    k1, k2, k3, k4 = jax.random.split(key, 4)
    in_dim = emb_size * 3
    hid = emb_size
    out_dim = emb_size * encoder_layers
    std = 0.01
    return {
        "w1": (std * jax.random.normal(k1, (in_dim, hid))).astype(dtype),
        "b1": (std * jax.random.normal(k2, (1, hid))).astype(dtype),
        "w2": (std * jax.random.normal(k3, (hid, out_dim))).astype(dtype),
        "b2": (std * jax.random.normal(k4, (1, out_dim))).astype(dtype),
    }


def _reference(side_infos, params):
    x = jnp.concatenate(side_infos, axis=1)
    h = jnp.maximum(x @ params["w1"] + params["b1"].reshape(1, -1), 0.0)
    return h @ params["w2"] + params["b2"].reshape(1, -1)


if __name__ == "__main__":
    emb_size = 32
    encoder_layers = 2
    batch = 8

    key = jax.random.PRNGKey(0)
    kp, ka, kb, kc = jax.random.split(key, 4)
    params = init_params(kp, emb_size, encoder_layers)

    side_infos = [
        jax.random.normal(ka, (batch, emb_size), dtype=jnp.float32),
        jax.random.normal(kb, (batch, emb_size), dtype=jnp.float32),
        jax.random.normal(kc, (batch, emb_size), dtype=jnp.float32),
    ]

    ref = _reference(side_infos, params).reshape(-1, 1, encoder_layers, emb_size)

    # 1) f32 path (packed, lane-dense) -- exact semantics of the PyTorch module.
    out = prefix_gen_forward(
        side_infos, params, emb_size=emb_size, encoder_layers=encoder_layers)
    out = jax.block_until_ready(out)
    assert out.shape == (batch, 1, encoder_layers, emb_size), out.shape
    assert jnp.allclose(out, ref, atol=1e-5, rtol=1e-5), "f32 mismatch vs reference"

    # 2) bf16-streaming path -- halves HBM bytes; f32 accumulation & biases.
    out_bf16 = prefix_gen_forward(
        side_infos, params, emb_size=emb_size, encoder_layers=encoder_layers,
        stream_dtype=jnp.bfloat16)
    out_bf16 = jax.block_until_ready(out_bf16)
    assert jnp.allclose(out_bf16.astype(jnp.float32), ref, atol=2e-3, rtol=5e-2), \
        "bf16 mismatch vs reference"

    # 3) ragged / multi-step grid check (packed rows not divisible by the tile).
    B2 = 200
    ks = jax.random.split(jax.random.PRNGKey(1), 3)
    side2 = [jax.random.normal(ks[i], (B2, emb_size), dtype=jnp.float32)
             for i in range(3)]
    out2 = prefix_gen_forward(
        side2, params, emb_size=emb_size, encoder_layers=encoder_layers,
        batch_tile=64)
    out2 = jax.block_until_ready(out2)
    ref2 = _reference(side2, params).reshape(-1, 1, encoder_layers, emb_size)
    assert out2.shape == (B2, 1, encoder_layers, emb_size), out2.shape
    assert jnp.allclose(out2, ref2, atol=1e-5, rtol=1e-5), "ragged mismatch"

    # 4) unpacked fallback (B not divisible by any packing factor) + ragged grid.
    B3 = 9
    ks3 = jax.random.split(jax.random.PRNGKey(2), 3)
    side3 = [jax.random.normal(ks3[i], (B3, emb_size), dtype=jnp.float32)
             for i in range(3)]
    out3 = prefix_gen_forward(
        side3, params, emb_size=emb_size, encoder_layers=encoder_layers)
    out3 = jax.block_until_ready(out3)
    ref3 = _reference(side3, params).reshape(-1, 1, encoder_layers, emb_size)
    assert out3.shape == (B3, 1, encoder_layers, emb_size), out3.shape
    assert jnp.allclose(out3, ref3, atol=1e-5, rtol=1e-5), "fallback mismatch"

    print("KERNEL_OK")
</pallas_src>

<mosaic_0001>
module attributes {stable_mosaic.version = 11 : i64} {
  func.func @_prefix_gen_kernel(%arg0: i32, %arg1: memref<2x128xf32, #tpu.memory_space<vmem>>, %arg2: memref<2x128xf32, #tpu.memory_space<vmem>>, %arg3: memref<2x128xf32, #tpu.memory_space<vmem>>, %arg4: memref<128x128xf32, #tpu.memory_space<vmem>>, %arg5: memref<128x128xf32, #tpu.memory_space<vmem>>, %arg6: memref<128x128xf32, #tpu.memory_space<vmem>>, %arg7: memref<1x128xf32, #tpu.memory_space<vmem>>, %arg8: memref<128x256xf32, #tpu.memory_space<vmem>>, %arg9: memref<1x256xf32, #tpu.memory_space<vmem>>, %arg10: memref<2x256xf32, #tpu.memory_space<vmem>>) attributes {dimension_semantics = [#tpu.dimension_semantics<parallel>], iteration_bounds = array<i64: 1>, scalar_prefetch = 0 : i64, scratch_operands = 0 : i64, tpu.core_type = #tpu.core_type<tc>, window_params = [{transform_indices = @transform_0, window_bounds = array<i64: 2, 128>}, {transform_indices = @transform_1, window_bounds = array<i64: 2, 128>}, {transform_indices = @transform_2, window_bounds = array<i64: 2, 128>}, {pipeline_mode = #tpu.pipeline_mode<synchronous>, transform_indices = @transform_3, window_bounds = array<i64: 128, 128>}, {pipeline_mode = #tpu.pipeline_mode<synchronous>, transform_indices = @transform_4, window_bounds = array<i64: 128, 128>}, {pipeline_mode = #tpu.pipeline_mode<synchronous>, transform_indices = @transform_5, window_bounds = array<i64: 128, 128>}, {pipeline_mode = #tpu.pipeline_mode<synchronous>, transform_indices = @transform_6, window_bounds = array<i64: 1, 128>}, {pipeline_mode = #tpu.pipeline_mode<synchronous>, transform_indices = @transform_7, window_bounds = array<i64: 128, 256>}, {pipeline_mode = #tpu.pipeline_mode<synchronous>, transform_indices = @transform_8, window_bounds = array<i64: 1, 256>}, {transform_indices = @transform_9, window_bounds = array<i64: 2, 256>}]} {
    %c0 = arith.constant 0 : index
    %c0_0 = arith.constant 0 : index
    %0 = vector.load %arg1[%c0, %c0_0] : memref<2x128xf32, #tpu.memory_space<vmem>>, vector<2x128xf32>
    %c0_1 = arith.constant 0 : index
    %c0_2 = arith.constant 0 : index
    %1 = vector.load %arg4[%c0_1, %c0_2] : memref<128x128xf32, #tpu.memory_space<vmem>>, vector<128x128xf32>
    %cst = arith.constant dense<0.000000e+00> : vector<2x128xf32>
    %2 = tpu.matmul %0, %1, %cst {dimension_numbers = #tpu.dot_dimension_numbers<[1], [0], [0], [1], [0, 0, 1, 1], [], []>} : vector<2x128xf32>, vector<128x128xf32>, vector<2x128xf32> -> vector<2x128xf32>
    %c0_3 = arith.constant 0 : index
    %c0_4 = arith.constant 0 : index
    %3 = vector.load %arg2[%c0_3, %c0_4] : memref<2x128xf32, #tpu.memory_space<vmem>>, vector<2x128xf32>
    %c0_5 = arith.constant 0 : index
    %c0_6 = arith.constant 0 : index
    %4 = vector.load %arg5[%c0_5, %c0_6] : memref<128x128xf32, #tpu.memory_space<vmem>>, vector<128x128xf32>
    %cst_7 = arith.constant dense<0.000000e+00> : vector<2x128xf32>
    %5 = tpu.matmul %3, %4, %cst_7 {dimension_numbers = #tpu.dot_dimension_numbers<[1], [0], [0], [1], [0, 0, 1, 1], [], []>} : vector<2x128xf32>, vector<128x128xf32>, vector<2x128xf32> -> vector<2x128xf32>
    %6 = arith.addf %2, %5 : vector<2x128xf32>
    %c0_8 = arith.constant 0 : index
    %c0_9 = arith.constant 0 : index
    %7 = vector.load %arg3[%c0_8, %c0_9] : memref<2x128xf32, #tpu.memory_space<vmem>>, vector<2x128xf32>
    %c0_10 = arith.constant 0 : index
    %c0_11 = arith.constant 0 : index
    %8 = vector.load %arg6[%c0_10, %c0_11] : memref<128x128xf32, #tpu.memory_space<vmem>>, vector<128x128xf32>
    %cst_12 = arith.constant dense<0.000000e+00> : vector<2x128xf32>
    %9 = tpu.matmul %7, %8, %cst_12 {dimension_numbers = #tpu.dot_dimension_numbers<[1], [0], [0], [1], [0, 0, 1, 1], [], []>} : vector<2x128xf32>, vector<128x128xf32>, vector<2x128xf32> -> vector<2x128xf32>
    %10 = arith.addf %6, %9 : vector<2x128xf32>
    %c0_13 = arith.constant 0 : index
    %c0_14 = arith.constant 0 : index
    %11 = vector.load %arg7[%c0_13, %c0_14] : memref<1x128xf32, #tpu.memory_space<vmem>>, vector<1x128xf32>
    %12 = vector.broadcast %11 : vector<1x128xf32> to vector<2x128xf32>
    %13 = arith.addf %10, %12 : vector<2x128xf32>
    %cst_15 = arith.constant 0.000000e+00 : f32
    %14 = vector.broadcast %cst_15 : f32 to vector<2x128xf32>
    %15 = arith.maximumf %13, %14 : vector<2x128xf32>
    %c0_16 = arith.constant 0 : index
    %c0_17 = arith.constant 0 : index
    %16 = vector.load %arg8[%c0_16, %c0_17] : memref<128x256xf32, #tpu.memory_space<vmem>>, vector<128x256xf32>
    %cst_18 = arith.constant dense<0.000000e+00> : vector<2x256xf32>
    %17 = tpu.matmul %15, %16, %cst_18 {dimension_numbers = #tpu.dot_dimension_numbers<[1], [0], [0], [1], [0, 0, 1, 1], [], []>} : vector<2x128xf32>, vector<128x256xf32>, vector<2x256xf32> -> vector<2x256xf32>
    %c0_19 = arith.constant 0 : index
    %c0_20 = arith.constant 0 : index
    %18 = vector.load %arg9[%c0_19, %c0_20] : memref<1x256xf32, #tpu.memory_space<vmem>>, vector<1x256xf32>
    %19 = vector.broadcast %18 : vector<1x256xf32> to vector<2x256xf32>
    %20 = arith.addf %17, %19 : vector<2x256xf32>
    %c0_21 = arith.constant 0 : index
    %c0_22 = arith.constant 0 : index
    %21 = vector.load %arg10[%c0_21, %c0_22] : memref<2x256xf32, #tpu.memory_space<vmem>>, vector<2x256xf32>
    tpu.vector_store %arg10[%c0_21, %c0_22], %20 {strides = array<i32>} : memref<2x256xf32, #tpu.memory_space<vmem>>, vector<2x256xf32>,
    return
  }
  func.func @transform_0(%arg0: i32) -> (i32, i32) {
    %c0_i32 = arith.constant 0 : i32
    %c0_i32_0 = arith.constant 0 : i32
    return %arg0, %c0_i32 : i32, i32
  }
  func.func @transform_1(%arg0: i32) -> (i32, i32) {
    %c0_i32 = arith.constant 0 : i32
    %c0_i32_0 = arith.constant 0 : i32
    return %arg0, %c0_i32 : i32, i32
  }
  func.func @transform_2(%arg0: i32) -> (i32, i32) {
    %c0_i32 = arith.constant 0 : i32
    %c0_i32_0 = arith.constant 0 : i32
    return %arg0, %c0_i32 : i32, i32
  }
  func.func @transform_3(%arg0: i32) -> (i32, i32) {
    %c0_i32 = arith.constant 0 : i32
    %c0_i32_0 = arith.constant 0 : i32
    %c0_i32_1 = arith.constant 0 : i32
    return %c0_i32, %c0_i32_0 : i32, i32
  }
  func.func @transform_4(%arg0: i32) -> (i32, i32) {
    %c0_i32 = arith.constant 0 : i32
    %c0_i32_0 = arith.constant 0 : i32
    %c0_i32_1 = arith.constant 0 : i32
    return %c0_i32, %c0_i32_0 : i32, i32
  }
  func.func @transform_5(%arg0: i32) -> (i32, i32) {
    %c0_i32 = arith.constant 0 : i32
    %c0_i32_0 = arith.constant 0 : i32
    %c0_i32_1 = arith.constant 0 : i32
    return %c0_i32, %c0_i32_0 : i32, i32
  }
  func.func @transform_6(%arg0: i32) -> (i32, i32) {
    %c0_i32 = arith.constant 0 : i32
    %c0_i32_0 = arith.constant 0 : i32
    %c0_i32_1 = arith.constant 0 : i32
    return %c0_i32, %c0_i32_0 : i32, i32
  }
  func.func @transform_7(%arg0: i32) -> (i32, i32) {
    %c0_i32 = arith.constant 0 : i32
    %c0_i32_0 = arith.constant 0 : i32
    %c0_i32_1 = arith.constant 0 : i32
    return %c0_i32, %c0_i32_0 : i32, i32
  }
  func.func @transform_8(%arg0: i32) -> (i32, i32) {
    %c0_i32 = arith.constant 0 : i32
    %c0_i32_0 = arith.constant 0 : i32
    %c0_i32_1 = arith.constant 0 : i32
    return %c0_i32, %c0_i32_0 : i32, i32
  }
  func.func @transform_9(%arg0: i32) -> (i32, i32) {
    %c0_i32 = arith.constant 0 : i32
    %c0_i32_0 = arith.constant 0 : i32
    return %arg0, %c0_i32 : i32, i32
  }
}

</mosaic_0001>

<bundles_post_ra>
// kernel: tpu_custom_call.1
= control target key start
LH: loop header
LB: loop body
LE: loop exit
PB: predicated region body
PF: predicated region fallthrough
CT: control target
= control target key end

     0   :  { %14 = vsyncpa [#allocation3], 0  ;;  %s1116_s0 = inlined_call_operand.hbm [shape: f32[2,128], index: 0, kind: input, shape index: {}]   ;;  %s1117_s1 = inlined_call_operand.vmem [shape: f32[2,128], index: 1, kind: input, shape index: {}]   ;;  %s1118_s2 = inlined_call_operand.vmem [shape: f32[2,128], index: 2, kind: input, shape index: {}]   ;;  %s1119_s3 = inlined_call_operand.hbm [shape: f32[128,128], index: 3, kind: input, shape index: {}]   ;;  %s1120_s4 = inlined_call_operand.hbm [shape: f32[128,128], index: 4, kind: input, shape index: {}]   ;;  %s1121_s5 = inlined_call_operand.hbm [shape: f32[128,128], index: 5, kind: input, shape index: {}]   ;;  %s1122_s6 = inlined_call_operand.vmem [shape: f32[1,128], index: 6, kind: input, shape index: {}]   ;;  %s1123_s7 = inlined_call_operand.hbm [shape: f32[128,256], index: 7, kind: input, shape index: {}]   ;;  %s1124_s8 = inlined_call_operand.vmem [shape: f32[1,256], index: 8, kind: input, shape index: {}]   ;;  %s1125_s9 = inlined_call_operand.hbm [shape: f32[2,256], index: 9, kind: output, shape index: {}]  }
   0x1   :  { %15 = vsyncpa [#allocation6], 0 }
   0x2   :  { %16 = vsyncpa [#allocation9], 0 }
   0x3   :  { %17 = vsyncpa [#allocation4], 0  ;;  %s929_s30 = smov [#allocation5]   ;;  %s789_s13 = scalar_lea.hbm %s1119_s3, 2048 }
   0x4   :  { %s37_s10 = sshll.u32 %s929_s30, 4  ;;  %p790_p0 = scmp.ne.s32.totalorder %s1119_s3, %s789_s13  ;;  %s38_s10 = int_to_ptr.vmem [resolvable:$true] %s37_s10 }
   0x5   :  { %p793_p1 = scmp.lt.u32.totalorder %s789_s13, %s1119_s3 }
   0x7   :  { %p795_p2 = pnand %p793_p1, %p790_p0 }
   0x9   :  { %798 = shalt.err (!%p795_p2)
}
   0xa   :  { %s799_s18 = scalar_lea.vmem %s38_s10, 2048  ;;  %p804_p4 = scmp.lt.s32.totalorder %s38_s10, %s38_s10 }
   0xb   :  { %p800_p3 = scmp.ne.s32.totalorder %s38_s10, %s799_s18  ;;  %p805_p5 = scmp.lt.s32.totalorder %s799_s18, %s799_s18 }
   0xd   :  { %p806_p6 = por %p805_p5, %p804_p4 }
   0xf   :  { %p807_p7 = pnand %p806_p6, %p800_p3 }
  0x11   :  { %810 = shalt.err (!%p807_p7)
}
  0x12   :  { %s930_s19 = smov 128   ;;  %s931_s20 = smov 8  }
  0x13   :  { %43 = dma.hbm_to_vmem [thread:$0]  %s1119_s3, 2048, %s38_s10, [#allocation6], %s930_s19, %s930_s19, %s931_s20  }
  0x14   :  { %s932_s23 = smov [#allocation8]   ;;  %s933_s25 = smov [#allocation2]  }
  0x15   :  { %s61_s24 = sshll.u32 %s932_s23, 4  ;;  %s24_s26 = sshll.u32 %s933_s25, 4  ;;  %s62_s24 = int_to_ptr.vmem [resolvable:$true] %s61_s24  ;;  %s25_s26 = int_to_ptr.vmem [resolvable:$true] %s24_s26 }
  0x16   :  { %s811_s29 = scalar_lea.hbm %s1121_s5, 2048 }
  0x17   :  { %p812_p8 = scmp.ne.s32.totalorder %s1121_s5, %s811_s29  ;;  %p815_p9 = scmp.lt.u32.totalorder %s811_s29, %s1121_s5 }
  0x19   :  { %p817_p10 = pnand %p815_p9, %p812_p8 }
  0x1b   :  { %820 = shalt.err (!%p817_p10)
}
  0x1c   :  { %s821_s3 = scalar_lea.vmem %s62_s24, 2048  ;;  %p826_p12 = scmp.lt.s32.totalorder %s62_s24, %s62_s24 }
  0x1d   :  { %p822_p11 = scmp.ne.s32.totalorder %s62_s24, %s821_s3  ;;  %p827_p13 = scmp.lt.s32.totalorder %s821_s3, %s821_s3 }
  0x1f   :  { %p828_p0 = por %p827_p13, %p826_p12 }
  0x21   :  { %p829_p1 = pnand %p828_p0, %p822_p11 }
  0x23   :  { %832 = shalt.err (!%p829_p1)
}
  0x24   :  { %67 = dma.hbm_to_vmem [thread:$0]  %s1121_s5, 2048, %s62_s24, [#allocation9], %s930_s19, %s930_s19, %s931_s20  }
  0x25   :  { %s833_s17 = scalar_lea.hbm %s1116_s0, 32 }
  0x26   :  { %p834_p2 = scmp.ne.s32.totalorder %s1116_s0, %s833_s17  ;;  %p837_p3 = scmp.lt.u32.totalorder %s833_s17, %s1116_s0 }
  0x28   :  { %p839_p4 = pnand %p837_p3, %p834_p2 }
  0x2a   :  { %842 = shalt.err (!%p839_p4)
}
  0x2b   :  { %s843_s25 = scalar_lea.vmem %s25_s26, 32  ;;  %p848_p6 = scmp.lt.s32.totalorder %s25_s26, %s25_s26 }
  0x2c   :  { %p844_p5 = scmp.ne.s32.totalorder %s25_s26, %s843_s25  ;;  %p849_p7 = scmp.lt.s32.totalorder %s843_s25, %s843_s25 }
  0x2e   :  { %p850_p8 = por %p849_p7, %p848_p6 }
  0x30   :  { %p851_p9 = pnand %p850_p8, %p844_p5 }
  0x32   :  { %854 = shalt.err (!%p851_p9)
}
  0x33   :  { %27 = dma.hbm_to_vmem [thread:$0]  %s1116_s0, 32, %s25_s26, [#allocation3]  }
  0x34   :  { %s934_s27 = smov [#allocation7]   ;;  %s935_s29 = smov [#allocation10]  }
  0x35   :  { %s49_s28 = sshll.u32 %s934_s27, 4  ;;  %s75_s30 = sshll.u32 %s935_s29, 4  ;;  %s50_s28 = int_to_ptr.vmem [resolvable:$true] %s49_s28  ;;  %s76_s30 = int_to_ptr.vmem [resolvable:$true] %s75_s30 }
  0x36   :  { %s855_s13 = scalar_lea.hbm %s1120_s4, 2048 }
  0x37   :  { %p856_p10 = scmp.ne.s32.totalorder %s1120_s4, %s855_s13  ;;  %p859_p11 = scmp.lt.u32.totalorder %s855_s13, %s1120_s4 }
  0x39   :  { %p861_p12 = pnand %p859_p11, %p856_p10 }
  0x3b   :  { %864 = shalt.err (!%p861_p12)
}
  0x3c   :  { %s865_s0 = scalar_lea.vmem %s50_s28, 2048  ;;  %p870_p0 = scmp.lt.s32.totalorder %s50_s28, %s50_s28 }
  0x3d   :  { %p866_p13 = scmp.ne.s32.totalorder %s50_s28, %s865_s0  ;;  %p871_p1 = scmp.lt.s32.totalorder %s865_s0, %s865_s0 }
  0x3f   :  { %p872_p2 = por %p871_p1, %p870_p0 }
  0x41   :  { %p873_p3 = pnand %p872_p2, %p866_p13 }
  0x43   :  { %876 = shalt.err (!%p873_p3)
}
  0x44   :  { %55 = dma.hbm_to_vmem [thread:$0]  %s1120_s4, 2048, %s50_s28, [#allocation6], %s930_s19, %s930_s19, %s931_s20  }
  0x45   :  { %s877_s21 = scalar_lea.hbm %s1123_s7, 4096 }
  0x46   :  { %p878_p4 = scmp.ne.s32.totalorder %s1123_s7, %s877_s21  ;;  %p881_p5 = scmp.lt.u32.totalorder %s877_s21, %s1123_s7 }
  0x48   :  { %p883_p6 = pnand %p881_p5, %p878_p4 }
  0x4a   :  { %886 = shalt.err (!%p883_p6)
}
  0x4b   :  { %s887_s24 = scalar_lea.vmem %s76_s30, 4096  ;;  %p892_p8 = scmp.lt.s32.totalorder %s76_s30, %s76_s30 }
  0x4c   :  { %p888_p7 = scmp.ne.s32.totalorder %s76_s30, %s887_s24  ;;  %p893_p9 = scmp.lt.s32.totalorder %s887_s24, %s887_s24 }
  0x4e   :  { %p894_p10 = por %p893_p9, %p892_p8 }
  0x50   :  { %p895_p11 = pnand %p894_p10, %p888_p7 }
  0x52   :  { %898 = shalt.err (!%p895_p11)
}
  0x53   :  { %s936_s4 = smov 256   ;;  %s937_s19 = smov 16  }
  0x54   :  { %81 = dma.hbm_to_vmem [thread:$0]  %s1123_s7, 4096, %s76_s30, [#allocation9], %s936_s4, %s936_s4, %s937_s19  }
  0x55   :  { %921 = dma.done.wait [#allocation3], 32  }
  0x56   :  { %922 = vsyncadd [#allocation3], 4294967264 }
  0x57   :  { %923 = dma.done.wait [#allocation6], 4096  }
  0x58   :  { %924 = vsyncadd [#allocation6], 4294963200 }
  0x59   :  { %925 = dma.done.wait [#allocation9], 6144  }
  0x5a   :  { %926 = vsyncadd [#allocation9], 4294961152  ;;  %v938_v0 = vmov 0.0|0.0   ;;  %vm939_vm0 = vmmov 0   ;;  %v940_v1 = vmov 0.0   ;;  %v117_v2 = vld [vmem:[#allocation7] sm:$0xff] }
  0x5b   :  { %672 = vmatprep.subr.bf16.mxu0 %v938_v0  ;;  %696 = vmatprep.subr.bf16.mxu1 %v938_v0  ;;  %v118_v3 = vld [vmem:[#allocation7 + $0x8] sm:$0xff]  ;;  %v100_v4 = vld [vmem:[#allocation5] sm:$0xff]  ;;  %v119_v7 = vld [vmem:[#allocation7 + $0x10] sm:$0xff]  ;;  %s941_s13 = smov [#allocation11]  }
  0x5c   :  { %599 = vmatprep.mubr.msk.f32.mxu0 %vm939_vm0, %v940_v1  ;;  %634 = vmatprep.mubr.msk.f32.mxu1 %vm939_vm0, %v940_v1  ;;  %v673_v5 = vpack.c.bf16 %v118_v3, %v117_v2  ;;  %v101_v6 = vld [vmem:[#allocation5 + $0x8] sm:$0xff]  ;;  %v120_v8 = vld [vmem:[#allocation7 + $0x18] sm:$0xff]  ;;  %v102_v10 = vld [vmem:[#allocation5 + $0x10] sm:$0xff] }
  0x5d   :  { %v697_v9 = vpack.c.bf16 %v101_v6, %v100_v4  ;;  %v103_v11 = vld [vmem:[#allocation5 + $0x18] sm:$0xff]  ;;  %v676_v12 = vpack.c.bf16 %v120_v8, %v119_v7  ;;  %v121_v14 = vld [vmem:[#allocation7 + $0x20] sm:$0xff]  ;;  %v122_v15 = vld [vmem:[#allocation7 + $0x28] sm:$0xff] }
  0x5e   :  { %674 = vmatpush3.bf16.msra.mxu0 %v673_v5  ;;  %v700_v13 = vpack.c.bf16 %v103_v11, %v102_v10  ;;  %v104_v16 = vld [vmem:[#allocation5 + $0x20] sm:$0xff]  ;;  %v105_v17 = vld [vmem:[#allocation5 + $0x28] sm:$0xff]  ;;  %v679_v18 = vpack.c.bf16 %v122_v15, %v121_v14  ;;  %v123_v20 = vld [vmem:[#allocation7 + $0x30] sm:$0xff] }
  0x5f   :  { %698 = vmatpush3.bf16.msra.mxu1 %v697_v9  ;;  %675 = vmatprep.subr.bf16.mxu0 %v938_v0  ;;  %v703_v19 = vpack.c.bf16 %v105_v17, %v104_v16  ;;  %v124_v21 = vld [vmem:[#allocation7 + $0x38] sm:$0xff]  ;;  %v106_v22 = vld [vmem:[#allocation5 + $0x30] sm:$0xff]  ;;  %v125_v26 = vld [vmem:[#allocation7 + $0x40] sm:$0xff] }
  0x60   :  { %699 = vmatprep.subr.bf16.mxu1 %v938_v0  ;;  %v107_v23 = vld [vmem:[#allocation5 + $0x38] sm:$0xff]  ;;  %v682_v24 = vpack.c.bf16 %v124_v21, %v123_v20  ;;  %v126_v27 = vld [vmem:[#allocation7 + $0x48] sm:$0xff]  ;;  %v108_v28 = vld [vmem:[#allocation5 + $0x40] sm:$0xff] }
  0x61   :  { %v706_v25 = vpack.c.bf16 %v107_v23, %v106_v22  ;;  %v109_v29 = vld [vmem:[#allocation5 + $0x48] sm:$0xff]  ;;  %v685_v30 = vpack.c.bf16 %v126_v27, %v125_v26  ;;  %v127_v32 = vld [vmem:[#allocation7 + $0x50] sm:$0xff]  ;;  %v128_v33 = vld [vmem:[#allocation7 + $0x58] sm:$0xff] }
  0x62   :  { %677 = vmatpush3.bf16.msra.mxu0 %v676_v12  ;;  %v709_v31 = vpack.c.bf16 %v109_v29, %v108_v28  ;;  %v110_v34 = vld [vmem:[#allocation5 + $0x50] sm:$0xff]  ;;  %v111_v35 = vld [vmem:[#allocation5 + $0x58] sm:$0xff]  ;;  %v688_v36 = vpack.c.bf16 %v128_v33, %v127_v32  ;;  %v129_v38 = vld [vmem:[#allocation7 + $0x60] sm:$0xff] }
  0x63   :  { %701 = vmatpush3.bf16.msra.mxu1 %v700_v13  ;;  %678 = vmatprep.subr.bf16.mxu0 %v938_v0  ;;  %v712_v37 = vpack.c.bf16 %v111_v35, %v110_v34  ;;  %v130_v39 = vld [vmem:[#allocation7 + $0x68] sm:$0xff]  ;;  %v112_v40 = vld [vmem:[#allocation5 + $0x60] sm:$0xff]  ;;  %v131_v44 = vld [vmem:[#allocation7 + $0x70] sm:$0xff] }
  0x64   :  { %702 = vmatprep.subr.bf16.mxu1 %v938_v0  ;;  %v113_v41 = vld [vmem:[#allocation5 + $0x68] sm:$0xff]  ;;  %v691_v42 = vpack.c.bf16 %v130_v39, %v129_v38  ;;  %v132_v45 = vld [vmem:[#allocation7 + $0x78] sm:$0xff]  ;;  %v114_v46 = vld [vmem:[#allocation5 + $0x70] sm:$0xff] }
  0x65   :  { %v715_v43 = vpack.c.bf16 %v113_v41, %v112_v40  ;;  %v115_v47 = vld [vmem:[#allocation5 + $0x78] sm:$0xff]  ;;  %v694_v48 = vpack.c.bf16 %v132_v45, %v131_v44  ;;  %v274_v50 = vld [vmem:[#allocation8] sm:$0xff]  ;;  %v275_v51 = vld [vmem:[#allocation8 + $0x8] sm:$0xff] }
  0x66   :  { %680 = vmatpush3.bf16.msra.mxu0 %v679_v18  ;;  %v718_v49 = vpack.c.bf16 %v115_v47, %v114_v46  ;;  %v116_v52 = vld [vmem:[%s1117_s1] sm:$0x3]  ;;  %v721_v53 = vpack.c.bf16 %v275_v51, %v274_v50  ;;  %v276_v55 = vld [vmem:[#allocation8 + $0x10] sm:$0xff]  ;;  %v278_v58 = vld [vmem:[#allocation8 + $0x20] sm:$0xff] }
  0x67   :  { %704 = vmatpush3.bf16.msra.mxu1 %v703_v19  ;;  %681 = vmatprep.subr.bf16.mxu0 %v938_v0  ;;  %v99_v54 = vld [vmem:[#allocation2] sm:$0x3]  ;;  %v279_v59 = vld [vmem:[#allocation8 + $0x28] sm:$0xff]  ;;  %v280_v61 = vld [vmem:[#allocation8 + $0x30] sm:$0xff] }
  0x68   :  { %705 = vmatprep.subr.bf16.mxu1 %v938_v0  ;;  %v277_v56 = vld [vmem:[#allocation8 + $0x18] sm:$0xff]  ;;  %v727_v60 = vpack.c.bf16 %v279_v59, %v278_v58  ;;  %v282_v2 = vld [vmem:[#allocation8 + $0x40] sm:$0xff]  ;;  %v283_v3 = vld [vmem:[#allocation8 + $0x48] sm:$0xff] }
  0x69   :  { %v724_v57 = vpack.c.bf16 %v277_v56, %v276_v55  ;;  %v281_v62 = vld [vmem:[#allocation8 + $0x38] sm:$0xff]  ;;  %v733_v4 = vpack.c.bf16 %v283_v3, %v282_v2  ;;  %v284_v5 = vld [vmem:[#allocation8 + $0x50] sm:$0xff]  ;;  %v286_v7 = vld [vmem:[#allocation8 + $0x60] sm:$0xff] }
  0x6a   :  { %683 = vmatpush3.bf16.msra.mxu0 %v682_v24  ;;  %v730_v63 = vpack.c.bf16 %v281_v62, %v280_v61  ;;  %v285_v6 = vld [vmem:[#allocation8 + $0x58] sm:$0xff]  ;;  %v287_v8 = vld [vmem:[#allocation8 + $0x68] sm:$0xff]  ;;  %v288_v10 = vld [vmem:[#allocation8 + $0x70] sm:$0xff] }
  0x6b   :  { %707 = vmatpush3.bf16.msra.mxu1 %v706_v25  ;;  %684 = vmatprep.subr.bf16.mxu0 %v938_v0  ;;  %v739_v9 = vpack.c.bf16 %v287_v8, %v286_v7  ;;  %v289_v11 = vld [vmem:[#allocation8 + $0x78] sm:$0xff]  ;;  %v371_v14 = vld [vmem:[#allocation10 + $0x8] sm:$0xff]  ;;  %v370_v16 = vld [vmem:[#allocation10] sm:$0xff] }
  0x6c   :  { %708 = vmatprep.subr.bf16.mxu1 %v938_v0  ;;  %v742_v12 = vpack.c.bf16 %v289_v11, %v288_v10  ;;  %v273_v13 = vld [vmem:[%s1118_s2] sm:$0x3]  ;;  %v372_v18 = vld [vmem:[#allocation10 + $0x10] sm:$0xff]  ;;  %v375_v19 = vld [vmem:[#allocation10 + $0x28] sm:$0xff] }
  0x6d   :  { %v373_v15 = vld [vmem:[#allocation10 + $0x18] sm:$0xff]  ;;  %v746_v21 = vpack.c.bf16 %v372_v18, %v370_v16  ;;  %v374_v23 = vld [vmem:[#allocation10 + $0x20] sm:$0xff]  ;;  %v376_v24 = vld [vmem:[#allocation10 + $0x30] sm:$0xff] }
  0x6e   :  { %686 = vmatpush3.bf16.msra.mxu0 %v685_v30  ;;  %v744_v17 = vpack.c.bf16 %v373_v15, %v371_v14  ;;  %v377_v20 = vld [vmem:[#allocation10 + $0x38] sm:$0xff]  ;;  %v379_v25 = vld [vmem:[#allocation10 + $0x48] sm:$0xff]  ;;  %v750_v26 = vpack.c.bf16 %v376_v24, %v374_v23  ;;  %v378_v28 = vld [vmem:[#allocation10 + $0x40] sm:$0xff] }
  0x6f   :  { %710 = vmatpush3.bf16.msra.mxu1 %v709_v31  ;;  %687 = vmatprep.subr.bf16.mxu0 %v938_v0  ;;  %v748_v22 = vpack.c.bf16 %v377_v20, %v375_v19  ;;  %v380_v29 = vld [vmem:[#allocation10 + $0x50] sm:$0xff]  ;;  %v383_v30 = vld [vmem:[#allocation10 + $0x68] sm:$0xff]  ;;  %v385_v31 = vld [vmem:[#allocation10 + $0x78] sm:$0xff] }
  0x70   :  { %711 = vmatprep.subr.bf16.mxu1 %v938_v0  ;;  %v754_v32 = vpack.c.bf16 %v380_v29, %v378_v28  ;;  %v756_v33 = vpack.c.bf16 %v385_v31, %v383_v30  ;;  %v382_v34 = vld [vmem:[#allocation10 + $0x60] sm:$0xff]  ;;  %v384_v35 = vld [vmem:[#allocation10 + $0x70] sm:$0xff]  ;;  %v399_v55 = vld [vmem:[#allocation10 + $0xe8] sm:$0xff] }
  0x71   :  { %v758_v38 = vpack.c.bf16 %v384_v35, %v382_v34  ;;  %v386_v40 = vld [vmem:[#allocation10 + $0x80] sm:$0xff]  ;;  %v388_v41 = vld [vmem:[#allocation10 + $0x90] sm:$0xff]  ;;  %v401_v56 = vld [vmem:[#allocation10 + $0xf8] sm:$0xff] }
  0x72   :  { %689 = vmatpush3.bf16.msra.mxu0 %v688_v36  ;;  %v387_v36 = vld [vmem:[#allocation10 + $0x88] sm:$0xff]  ;;  %v762_v44 = vpack.c.bf16 %v388_v41, %v386_v40  ;;  %v390_v46 = vld [vmem:[#allocation10 + $0xa0] sm:$0xff]  ;;  %v392_v47 = vld [vmem:[#allocation10 + $0xb0] sm:$0xff] }
  0x73   :  { %713 = vmatpush3.bf16.msra.mxu1 %v712_v37  ;;  %690 = vmatprep.subr.bf16.mxu0 %v938_v0  ;;  %v389_v37 = vld [vmem:[#allocation10 + $0x98] sm:$0xff]  ;;  %v766_v50 = vpack.c.bf16 %v392_v47, %v390_v46  ;;  %v398_v58 = vld [vmem:[#allocation10 + $0xe0] sm:$0xff]  ;;  %v400_v59 = vld [vmem:[#allocation10 + $0xf0] sm:$0xff] }
  0x74   :  { %714 = vmatprep.subr.bf16.mxu1 %v938_v0  ;;  %v760_v39 = vpack.c.bf16 %v389_v37, %v387_v36 }
  0x76   :  { %692 = vmatpush3.bf16.msra.mxu0 %v691_v42  ;;  %v391_v42 = vld [vmem:[#allocation10 + $0xa8] sm:$0xff] }
  0x77   :  { %716 = vmatpush3.bf16.msra.mxu1 %v715_v43  ;;  %693 = vmatprep.subr.bf16.mxu0 %v938_v0  ;;  %v393_v43 = vld [vmem:[#allocation10 + $0xb8] sm:$0xff] }
  0x78   :  { %717 = vmatprep.subr.bf16.mxu1 %v938_v0  ;;  %v764_v45 = vpack.c.bf16 %v393_v43, %v391_v42 }
  0x7a   :  { %695 = vmatpush3.bf16.msra.mxu0 %v694_v48  ;;  %v395_v48 = vld [vmem:[#allocation10 + $0xc8] sm:$0xff] }
  0x7b   :  { %719 = vmatpush3.bf16.msra.mxu1 %v718_v49  ;;  %720 = vmatprep.subr.bf16.mxu0 %v938_v0  ;;  %v397_v49 = vld [vmem:[#allocation10 + $0xd8] sm:$0xff] }
  0x7c   :  { %745 = vmatprep.subr.bf16.mxu1 %v744_v17  ;;  %v768_v51 = vpack.c.bf16 %v397_v49, %v395_v48 }
  0x7d   :  { %600 = vmatmul.mubr.f32.vlgmr.msra.gmra.mrb[0].mxu0 %v116_v52  ;;  %v394_v52 = vld [vmem:[#allocation10 + $0xc0] sm:$0xff] }
  0x7e   :  { %635 = vmatmul.mubr.f32.vlgmr.msra.gmra.mrb[0].mxu1 %v99_v54  ;;  %722 = vmatpush3.bf16.msra.mxu0 %v721_v53  ;;  %v396_v53 = vld [vmem:[#allocation10 + $0xd0] sm:$0xff] }
  0x7f   :  { %723 = vmatprep.subr.bf16.mxu0 %v938_v0  ;;  %669 = vmatprep.mubr.msk.f32.mxu0 %vm939_vm0, %v940_v1  ;;  %v770_v54 = vpack.c.bf16 %v396_v53, %v394_v52 }
  0x80   :  { %478 = vmatprep.mubr.f32.mxu1 %v940_v1  ;;  %v736_v1 = vpack.c.bf16 %v285_v6, %v284_v5  ;;  %747 = vmatpush1.bf16.msra.mxu1 %v746_v21  ;;  %v514_v5 = vld [vmem:[%s1122_s6] ss:$0 sm:$0xff]  ;;  %s503_s6 = sshll.u32 %s941_s13, 4  ;;  %s504_s6 = int_to_ptr.vmem [resolvable:$true] %s503_s6 }
  0x81   :  { %749 = vmatprep.subr.bf16.mxu1 %v748_v22  ;;  %s899_s3 = scalar_lea.vmem %s504_s6, 64  ;;  %p904_p13 = scmp.lt.s32.totalorder %s504_s6, %s504_s6 }
  0x82   :  { %725 = vmatpush3.bf16.msra.mxu0 %v724_v57  ;;  %v772_v57 = vpack.c.bf16 %v401_v56, %v399_v55  ;;  %p900_p12 = scmp.ne.s32.totalorder %s504_s6, %s899_s3  ;;  %p905_p0 = scmp.lt.s32.totalorder %s899_s3, %s899_s3 }
  0x83   :  { %726 = vmatprep.subr.bf16.mxu0 %v938_v0 }
  0x84   :  { %751 = vmatpush1.bf16.msra.mxu1 %v750_v26  ;;  %p906_p1 = por %p905_p0, %p904_p13 }
  0x86   :  { %728 = vmatpush3.bf16.msra.mxu0 %v727_v60  ;;  %v774_v60 = vpack.c.bf16 %v400_v59, %v398_v58  ;;  %p907_p2 = pnand %p906_p1, %p900_p12 }
  0x87   :  { %729 = vmatprep.subr.bf16.mxu0 %v938_v0 }
  0x8a   :  { %731 = vmatpush3.bf16.msra.mxu0 %v730_v63 }
  0x8b   :  { %732 = vmatprep.subr.bf16.mxu0 %v938_v0 }
  0x8e   :  { %734 = vmatpush3.bf16.msra.mxu0 %v733_v4 }
  0x8f   :  { %735 = vmatprep.subr.bf16.mxu0 %v938_v0 }
  0x92   :  { %737 = vmatpush3.bf16.msra.mxu0 %v736_v1 }
  0x93   :  { %738 = vmatprep.subr.bf16.mxu0 %v938_v0 }
  0x96   :  { %740 = vmatpush3.bf16.msra.mxu0 %v739_v9  ;;  %v404_v9 = vlaneseq }
  0x97   :  { %741 = vmatprep.subr.bf16.mxu0 %v938_v0  ;;  %v381_v0 = vld [vmem:[#allocation10 + $0x58] sm:$0xff] }
  0x98   :  { %v752_v27 = vpack.c.bf16 %v381_v0, %v379_v25  ;;  %v405_v10 = vshrl.u32 %v404_v9, 7 }
  0x9a   :  { %743 = vmatpush3.bf16.msra.mxu0 %v742_v12  ;;  %753 = vmatprep.subr.bf16.mxu1 %v752_v27  ;;  %v406_v11 = vsub.s32 0, %v405_v10  ;;  %v402_v12 = vld [vmem:[%s1124_s8] sm:$0x3] }
  0x9b   :  { %755 = vmatpush1.bf16.msra.mxu1 %v754_v32 }
  0x9c   :  { %757 = vmatprep.subr.bf16.mxu1 %v756_v33  ;;  %v407_v14 = vrot.slane %v402_v12, %v406_v11 }
  0x9d   :  { %670 = vmatmul.mubr.f32.vlgmr.msra.gmra.mrb[2].mxu0 %v273_v13  ;;  %v410_v13 = vsub.s32 1, %v405_v10 }
  0x9f   :  { %759 = vmatpush1.bf16.msra.mxu1 %v758_v38  ;;  %v411_v15 = vrot.slane %v402_v12, %v410_v13 }
  0xa0   :  { %761 = vmatprep.subr.bf16.mxu1 %v760_v39 }
  0xa3   :  { %763 = vmatpush1.bf16.msra.mxu1 %v762_v44 }
  0xa4   :  { %765 = vmatprep.subr.bf16.mxu1 %v764_v45 }
  0xa7   :  { %767 = vmatpush1.bf16.msra.mxu1 %v766_v50 }
  0xa8   :  { %769 = vmatprep.subr.bf16.mxu1 %v768_v51 }
  0xab   :  { %771 = vmatpush1.bf16.msra.mxu1 %v770_v54 }
  0xac   :  { %773 = vmatprep.subr.bf16.mxu1 %v772_v57 }
  0xaf   :  { %775 = vmatpush1.bf16.msra.mxu1 %v774_v60 }
 0x150   :  { %v199_v61 = vpop.f32.mrb[0].mxu0 }
 0x151   :  { %v601_v62 = vpop.f32.mrb[1].mxu0  ;;  %v269_v63 = vpop.f32.mrb[0].mxu1 }
 0x152   :  { %v270_v2 = vadd.f32 %v269_v63, %v199_v61  ;;  %v636_v3 = vpop.f32.mrb[1].mxu1 }
 0x170   :  { %v356_v4 = vpop.f32.mrb[2].mxu0 }
 0x171   :  { %v360_v6 = vadd.f32 %v356_v4, %v270_v2  ;;  %v671_v1 = vpop.f32.mrb[3].mxu0 }
 0x173   :  { %v368_v7 = vadd.f32 %v514_v5, %v360_v6 }
 0x175   :  { %v369_v8 = vmax.f32 %v368_v7, 0.0 }
 0x177   :  { %479 = vmatmul.mubr.f32.vlgmr.msra.gmra.mrb[2].mxu1 %v369_v8 }
 0x24a   :  { %v480_v16 = vpop.f32.mrb[2].mxu1 }
 0x24b   :  { %v481_v17 = vadd.f32 %v480_v16, %v407_v14  ;;  %v482_v18 = vpop.f32.mrb[3].mxu1 }
 0x24c   :  { %v483_v19 = vadd.f32 %v482_v18, %v411_v15 }
 0x24e   :  { %v487_v20 = vcombine.low %v481_v17, %v483_v19 }
 0x250   :  { %515 = vst.sshfl [vmem:[#allocation11] sm:$0x33 pattern:$0x76325410] %v487_v20 }
 0x251   :  { %910 = shalt.err (!%p907_p2)
}
 0x252   :  { %s911_s14 = scalar_lea.hbm %s1125_s9, 64 }
 0x253   :  { %p912_p3 = scmp.ne.s32.totalorder %s1125_s9, %s911_s14  ;;  %p915_p4 = scmp.lt.u32.totalorder %s911_s14, %s1125_s9 }
 0x255   :  { %p917_p5 = pnand %p915_p4, %p912_p3 }
 0x257   :  { %920 = shalt.err (!%p917_p5)
}
 0x258   :  { %506 = dma.vmem_to_hbm [thread:$0]  %s504_s6, 64, %s1125_s9, [#allocation4]  }
 0x259   :  { %927 = dma.done.wait [#allocation4], 64  }
 0x25a   :  { %928 = vsyncadd [#allocation4], 4294967232 }
 0x25b   :  { %510 = vsyncpa [#allocation3], 1 }
 0x25c   :  { %511 = vsyncpa [#allocation6], 1 }
 0x25d   :  { %512 = vsyncpa [#allocation9], 1 }
 0x25e   :  { %513 = vsyncpa [#allocation4], 1 }

</bundles_post_ra>
